<compile_context>
chip_gen: v7x
topology: tpu7x:2x2x1
jax: 0.10.0
libtpu: 0.0.40
codegen_flags: <defaults>
</compile_context>

<pallas_src>
import functools

import jax
import jax.numpy as jnp
from jax.experimental import pallas as pl
from jax.experimental.pallas import tpu as pltpu


def _layernorm_kernel(alpha_ref, beta_ref, x_ref, o_ref, *, eps, hidden, wide_dtype):
    # x_ref: (block_rows, hidden) tile in VMEM; alpha/beta: (1,) scalars in SMEM.
    x = x_ref[...]
    if x.dtype != wide_dtype:
        x = x.astype(wide_dtype)

    n = jnp.float32(hidden)

    # Pass 1: row mean (accumulate in f32).
    s1 = jnp.sum(x, axis=-1, keepdims=True, dtype=jnp.float32)
    mean = s1 / n                                            # (br, 1) f32

    # Pass 2 (VMEM-resident, zero extra HBM traffic): centered values and
    # unbiased variance.  `d` is reused for the output, so this costs the
    # same wide-op count as the single-pass s2 - n*mean^2 form but without
    # catastrophic cancellation.
    d = x - mean.astype(wide_dtype)                          # (br, hidden) wide
    s2 = jnp.sum(d * d, axis=-1, keepdims=True, dtype=jnp.float32)

    # torch.std is unbiased (divide by N-1); hidden == 1 yields NaN, matching
    # torch's behavior for a single element.
    std = jnp.sqrt(s2 / jnp.float32(hidden - 1))             # (br, 1) f32

    alpha = alpha_ref[0].astype(jnp.float32)
    beta = beta_ref[0].astype(jnp.float32)

    # One reciprocal per ROW (EUP) instead of a full (br, hidden) divide; fold
    # alpha into the per-row scale so the wide path is a single fused mul-add.
    inv = pl.reciprocal(std + jnp.float32(eps), approx=False)  # (br, 1) f32
    scale = (alpha * inv).astype(wide_dtype)                   # (br, 1)

    out = d * scale + beta.astype(wide_dtype)
    o_ref[...] = out.astype(o_ref.dtype)


def layer_normalization(x, alpha, beta, *, eps=1e-6, block_rows=None):
    """x: (..., hidden). alpha, beta: shape (1,) scalar params."""
    orig_shape = x.shape
    hidden = orig_shape[-1]
    rows = 1
    for s in orig_shape[:-1]:
        rows *= s
    x2 = x.reshape(rows, hidden)

    dtype_bytes = jnp.dtype(x.dtype).itemsize

    # Wide (per-element) math stays in bf16 on bf16 inputs (packed bf16 VALU
    # on v6e/v7x => 2x lanes/op); statistics are always accumulated in f32.
    # TODO(synk): on v5e (no bf16 VPU) an all-f32 wide path is marginally
    # better, but v5e is firmly HBM-bound here so the difference is noise.
    wide_dtype = jnp.bfloat16 if x.dtype == jnp.bfloat16 else jnp.float32

    if block_rows is None:
        # ~2 MiB tile (sized on f32-equivalent bytes so the in-kernel f32
        # temporaries scale with it).  Bigger tiles buy no bandwidth but
        # shrink the grid and eat VMEM.
        br = ((2 << 20) // max(1, hidden * 4)) // 8 * 8
        br = max(8, min(br, 8192))
        # Keep >= ~8 grid blocks when rows permit (>= 4 per TensorCore on
        # v7x with the "parallel" row axis) so each core reaches the
        # prefetch/compute/writeback steady state.
        cap = -(-rows // 8)                     # ceil(rows / 8 blocks)
        cap = max(8, -(-cap // 8) * 8)          # round up to a multiple of 8
        br = min(br, cap)
    else:
        br = max(8, (block_rows // 8) * 8)

    if rows < br:
        # Tiny inputs: one full-extent block (block dim == array dim is always
        # a legal layout, even when rows is not a multiple of 8).
        br = rows

    # Ragged last block (rows % br != 0) is handled by Pallas: the padded
    # rows compute junk but their stores are masked; rows are independent so
    # nothing mixes across them.  No jnp.pad / slice => no extra HBM passes.
    grid = (pl.cdiv(rows, br),)

    # Scoped-VMEM limit: 2x double-buffered in + 2x out in the source dtype
    # plus ~3 f32-wide temporaries, then doubled for margin; 32 MiB floor,
    # 48 MiB ceiling (safe under v7x's 64 MiB physical VMEM).
    tile_in = br * hidden * dtype_bytes
    est = 4 * tile_in + 3 * br * hidden * 4
    vmem_limit = int(min(48 << 20, max(32 << 20, 2 * est)))

    # Advisory cost hint: purely bandwidth-bound streaming op.
    cost = pl.CostEstimate(
        flops=8 * rows * hidden,
        transcendentals=2 * rows,                 # sqrt + reciprocal per row
        bytes_accessed=2 * rows * hidden * dtype_bytes,
    )

    kernel = functools.partial(
        _layernorm_kernel, eps=eps, hidden=hidden, wide_dtype=wide_dtype)

    # TODO(synk): for hidden < 128 / unaligned hidden the lane-per-hidden
    # layout uses masked vst.msk stores; a lane-dense repack (k rows per
    # 128-lane group with a segmented reduction) would help, but typical
    # transformer hidden sizes (multiples of 128) are already lane-dense.
    out2 = pl.pallas_call(
        kernel,
        out_shape=jax.ShapeDtypeStruct((rows, hidden), x.dtype),
        grid_spec=pltpu.PrefetchScalarGridSpec(
            num_scalar_prefetch=0,
            grid=grid,
            in_specs=[
                pl.BlockSpec(memory_space=pltpu.SMEM),          # alpha (1,)
                pl.BlockSpec(memory_space=pltpu.SMEM),          # beta  (1,)
                pl.BlockSpec((br, hidden), lambda i: (i, 0)),   # x tile
            ],
            out_specs=pl.BlockSpec((br, hidden), lambda i: (i, 0)),
        ),
        compiler_params=pltpu.CompilerParams(
            dimension_semantics=("parallel",),
            vmem_limit_bytes=vmem_limit,
        ),
        cost_estimate=cost,
    )(alpha, beta, x2)

    return out2.reshape(orig_shape)


if __name__ == "__main__":
    key = jax.random.PRNGKey(0)
    batch, seq, hidden = 2, 8, 32
    x = jax.random.normal(key, (batch, seq, hidden), dtype=jnp.float32)

    # Deterministic parameter init, matching nn.Parameter(torch.ones(1)/zeros(1)).
    alpha = jnp.ones((1,), dtype=jnp.float32)
    beta = jnp.zeros((1,), dtype=jnp.float32)
    eps = 1e-6

    out = layer_normalization(x, alpha, beta, eps=eps)
    out = jax.block_until_ready(out)

    # Pure-JAX reference (same unbiased-std semantics as torch.std).
    mean = jnp.mean(x, axis=-1, keepdims=True)
    d = x - mean
    std = jnp.sqrt(jnp.sum(d * d, axis=-1, keepdims=True) / (hidden - 1))
    ref = alpha[0] * d / (std + eps) + beta[0]

    assert out.shape == x.shape and out.dtype == x.dtype
    assert jnp.allclose(out, ref, atol=1e-5, rtol=1e-5)
    print("KERNEL_OK")
</pallas_src>

<mosaic_0001>
module attributes {stable_mosaic.version = 11 : i64} {
  func.func @_layernorm_kernel(%arg0: i32, %arg1: memref<1xf32, #tpu.memory_space<smem>>, %arg2: memref<1xf32, #tpu.memory_space<smem>>, %arg3: memref<8x32xf32, #tpu.memory_space<vmem>>, %arg4: memref<8x32xf32, #tpu.memory_space<vmem>>) attributes {dimension_semantics = [#tpu.dimension_semantics<parallel>], iteration_bounds = array<i64: 2>, scalar_prefetch = 0 : i64, scratch_operands = 0 : i64, tpu.core_type = #tpu.core_type<tc>, window_params = [{transform_indices = @transform_0, window_bounds = array<i64: 1>}, {transform_indices = @transform_1, window_bounds = array<i64: 1>}, {transform_indices = @transform_2, window_bounds = array<i64: 8, 32>}, {transform_indices = @transform_3, window_bounds = array<i64: 8, 32>}]} {
    %c0 = arith.constant 0 : index
    %c0_0 = arith.constant 0 : index
    %0 = vector.load %arg3[%c0, %c0_0] : memref<8x32xf32, #tpu.memory_space<vmem>>, vector<8x32xf32>
    %cst = arith.constant dense<0.000000e+00> : vector<8xf32>
    %1 = vector.multi_reduction <add>, %0, %cst [1] : vector<8x32xf32> to vector<8xf32>
    %2 = vector.shape_cast %1 : vector<8xf32> to vector<8x1xf32>
    %cst_1 = arith.constant 3.200000e+01 : f32
    %3 = vector.broadcast %cst_1 : f32 to vector<8x1xf32>
    %4 = arith.divf %2, %3 : vector<8x1xf32>
    %5 = vector.broadcast %4 : vector<8x1xf32> to vector<8x32xf32>
    %6 = arith.subf %0, %5 : vector<8x32xf32>
    %7 = arith.mulf %6, %6 : vector<8x32xf32>
    %cst_2 = arith.constant dense<0.000000e+00> : vector<8xf32>
    %8 = vector.multi_reduction <add>, %7, %cst_2 [1] : vector<8x32xf32> to vector<8xf32>
    %9 = vector.shape_cast %8 : vector<8xf32> to vector<8x1xf32>
    %cst_3 = arith.constant 3.100000e+01 : f32
    %10 = vector.broadcast %cst_3 : f32 to vector<8x1xf32>
    %11 = arith.divf %9, %10 : vector<8x1xf32>
    %12 = math.sqrt %11 : vector<8x1xf32>
    %c0_4 = arith.constant 0 : index
    %13 = memref.load %arg1[%c0_4] : memref<1xf32, #tpu.memory_space<smem>>
    %c0_5 = arith.constant 0 : index
    %14 = memref.load %arg2[%c0_5] : memref<1xf32, #tpu.memory_space<smem>>
    %cst_6 = arith.constant 9.99999997E-7 : f32
    %15 = vector.broadcast %cst_6 : f32 to vector<8x1xf32>
    %16 = arith.addf %12, %15 : vector<8x1xf32>
    %17 = tpu.reciprocal %16 : vector<8x1xf32> -> vector<8x1xf32>
    %18 = vector.broadcast %13 : f32 to vector<8x1xf32>
    %19 = arith.mulf %18, %17 : vector<8x1xf32>
    %20 = vector.broadcast %19 : vector<8x1xf32> to vector<8x32xf32>
    %21 = arith.mulf %6, %20 : vector<8x32xf32>
    %22 = vector.broadcast %14 : f32 to vector<8x32xf32>
    %23 = arith.addf %21, %22 : vector<8x32xf32>
    %c0_7 = arith.constant 0 : index
    %c0_8 = arith.constant 0 : index
    %24 = vector.load %arg4[%c0_7, %c0_8] : memref<8x32xf32, #tpu.memory_space<vmem>>, vector<8x32xf32>
    tpu.vector_store %arg4[%c0_7, %c0_8], %23 {strides = array<i32>} : memref<8x32xf32, #tpu.memory_space<vmem>>, vector<8x32xf32>,
    return
  }
  func.func @transform_0(%arg0: i32) -> i32 {
    %c0_i32 = arith.constant 0 : i32
    %c0_i32_0 = arith.constant 0 : i32
    return %c0_i32 : i32
  }
  func.func @transform_1(%arg0: i32) -> i32 {
    %c0_i32 = arith.constant 0 : i32
    %c0_i32_0 = arith.constant 0 : i32
    return %c0_i32 : i32
  }
  func.func @transform_2(%arg0: i32) -> (i32, i32) {
    %c0_i32 = arith.constant 0 : i32
    %c0_i32_0 = arith.constant 0 : i32
    return %arg0, %c0_i32 : i32, i32
  }
  func.func @transform_3(%arg0: i32) -> (i32, i32) {
    %c0_i32 = arith.constant 0 : i32
    %c0_i32_0 = arith.constant 0 : i32
    return %arg0, %c0_i32 : i32, i32
  }
}

</mosaic_0001>

<bundles_post_ra>
// kernel: tpu_custom_call.1
= control target key start
LH: loop header
LB: loop body
LE: loop exit
PB: predicated region body
PF: predicated region fallthrough
CT: control target
= control target key end

     0   :  { %s659_s0 = inlined_call_operand.<no memory space> [shape: f32[1], index: 0, kind: input, shape index: {}]   ;;  %s660_s1 = inlined_call_operand.<no memory space> [shape: f32[1], index: 1, kind: input, shape index: {}]   ;;  %s661_s2 = inlined_call_operand.hbm [shape: f32[16,32], index: 2, kind: input, shape index: {}]   ;;  %s662_s3 = inlined_call_operand.hbm [shape: f32[16,32], index: 3, kind: output, shape index: {}]  }
   0x1   :  { %8 = sst [smem:[#allocation2]] %s659_s0 }
   0x2   :  { %9 = sst [smem:[#allocation3]] %s660_s1 }
   0x3   :  { %10 = vsyncpa [#allocation5], 0 }
   0x4   :  { %12 = vsyncpa [#allocation5 + $0x1], 0 }
   0x5   :  { %13 = vsyncpa [#allocation6], 0 }
   0x6   :  { %15 = vsyncpa [#allocation6 + $0x1], 0  ;;  %s491_s16 = smov 0   ;;  %s493_s17 = smov 0  }
   0x7   :  { %s495_s18 = smov 0   ;;  %s497_s19 = smov 0  }
   0x8 LB: > { %s512_s0 = sadd.s32 4294967295, %s461_s19   ;;  %s303_s1 = sadd.s32 4294967294, %s461_s19   ;;  %s461_s19 = sphi %s497_s19, %s677_s19   ;;  %s457_s18 = sphi %s495_s18, %s676_s18   ;;  %s453_s17 = sphi %s493_s17, %s675_s17   ;;  %s449_s16 = sphi %s491_s16, %s674_s16  }
   0x9   : > { %s516_s20 = sadd.s32 1, %s461_s19   ;;  %s70_s21 = sadd.s32 1, %s457_s18 }
   0xa   : > { %s67_s22 = ssub.s32 %s461_s19, %s516_s20  ;;  %p77_p0 = scmp.ne.s32.totalorder %s457_s18, %s453_s17 }
   0xb   : > { %p68_p1 = scmp.eq.s32.totalorder %s67_s22, 0  ;;  %p78_p2 = scmp.eq.s32.totalorder %s461_s19, 0 }
   0xc   : > { %p83_p3 = scmp.ne.s32.totalorder %s453_s17, %s449_s16  ;;  %p84_p4 = scmp.eq.s32.totalorder %s512_s0, 0 }
   0xd   : > { %s528_s23 = scalar_select %p68_p1, %s457_s18, %s70_s21  }
   0xe   : > { %p530_p5 = por %p78_p2, %p77_p0  ;;  %p534_p6 = por %p84_p4, %p83_p3 }
   0xf   : > { %p107_p7 = scmp.eq.s32.totalorder %s512_s0, 1  ;;  %p113_p8 = scmp.eq.s32.totalorder %s303_s1, 1 }
  0x10   : > { %p327_p10 = scmp.lt.s32.totalorder %s461_s19, 2  ;;  %s139_s28 = sand.u32 1, %s457_s18  }
  0x11   : > { %p541_p11 = por %p107_p7, %p77_p0  ;;  %p545_p12 = por %p113_p8, %p83_p3 }
  0x12   : > { %s307_s29 = sshll.u32 %s461_s19, 7  ;;  %s306_s30 = sshll.u32 %s139_s28, 3 }
  0x13   : > { %s666_s26 = scalar_select %p541_p11, 1, 0 }
  0x14   : > { %s667_s27 = scalar_select %p545_p12, 1, 0 }
  0x15   : > { %s554_s6 = scalar_lea.hbm %s661_s2, %s307_s29  ;;  %s143_s7 = scalar_lea.vmem [#allocation4], %s306_s30 }
  0x16   : > { %s150_s8 = sshll.u32 %s143_s7, 4  ;;  %p558_p13 = pnand %p327_p10, %p530_p5  ;;  %s562_s8 = int_to_ptr.vmem [resolvable:$true] %s150_s8 }
  0x17   : > { %s140_s10 = scalar_lea.sflag [#allocation5], %s139_s28  ;;  %s365_s11 = scalar_lea.hbm %s554_s6, 128 }
  0x18   : > { %p366_p2 = scmp.ne.s32.totalorder %s554_s6, %s365_s11  ;;  %p367_p3 = pneg %p558_p13 }
  0x19   : > { %s370_s14 = scalar_lea.hbm %s661_s2, 256  ;;  %p371_p5 = scmp.lt.u32.totalorder %s554_s6, %s661_s2 }
  0x1a   : > { %p368_p4 = pnand %p367_p3, %p366_p2  ;;  %p372_p8 = scmp.lt.u32.totalorder %s370_s14, %s365_s11 }
  0x1b   : > { %p374_p9 = scmp.lt.u32.totalorder %s365_s11, %s554_s6 }
  0x1c   : > { %p369_p7 = pneg %p368_p4  ;;  %p373_p10 = por %p372_p8, %p371_p5 }
  0x1e   : > { %p375_p0 = por %p374_p9, %p373_p10 }
  0x20   : > { %p376_p1 = pnand %p375_p0, %p369_p7 }
  0x22   : > { %379 = shalt.err (!%p376_p1)
}
  0x23   : > { %s380_s21 = scalar_lea.vmem %s562_s8, 128  ;;  %s463_s22 = smov [#allocation4]  }
  0x24   : > { %p381_p2 = scmp.ne.s32.totalorder %s562_s8, %s380_s21  ;;  %s385_s24 = sshll.u32 %s463_s22, 4  ;;  %s386_s24 = int_to_ptr.vmem [resolvable:$false] %s385_s24 }
  0x25   : > { %s387_s28 = scalar_lea.vmem %s386_s24, 256  ;;  %p388_p11 = scmp.lt.s32.totalorder %s562_s8, %s386_s24 }
  0x26   : > { %p383_p4 = pnand %p381_p2, %p367_p3  ;;  %p389_p5 = scmp.lt.s32.totalorder %s387_s28, %s380_s21 }
  0x28   : > { %p384_p12 = pneg %p383_p4  ;;  %p390_p8 = por %p389_p5, %p388_p11 }
  0x2a   : > { %p391_p9 = pnand %p390_p8, %p384_p12 }
  0x2c   : > { %394 = shalt.err (!%p391_p9)
}
  0x2d   : > { %322 = dma.hbm_to_vmem [thread:$0]  (!%p558_p13), %s554_s6, 128, %s562_s8, %s140_s10  }
  0x2e   : > { %p669_p0 = scmp.lt.s32.totalorder %s461_s19, 3  ;;  %p670_p1 = scmp.ge.s32.totalorder %s461_s19, 1 }
  0x30   : > { %p156_p3 = pnand %p670_p1, %p669_p0 }
  0x31   : > { %s596_s29 = sand.u32 (!%p156_p3), 1, %s453_s17  }
  0x32   : > { %159 = sbr.rel (%p156_p3) target bundleno = 401 (0x191), region = 32  ;;  %s309_s30 = sshll.u32 (!%p156_p3), %s596_s29, 3 }
  0x33   : > { %s162_s4 = scalar_lea.sflag (!%p156_p3), [#allocation5], %s596_s29  ;;  %s165_s5 = scalar_lea.vmem (!%p156_p3), [#allocation4], %s309_s30 }
  0x39   : > { %440 = dma.done.wait (%p534_p6), %s162_s4, 128  }
  0x3a   : > { %442 = vsyncadd (%p534_p6), %s162_s4, 4294967168  ;;  %vm189_vm0 = vcmask 261120   ;;  %v188_v0 = vld [vmem:[%s165_s5] sm:$0xff]  ;;  %s209_s25 = sld [smem:[#allocation2]]  ;;  %s312_s7 = sshll.u32 %s512_s0, 7 }
  0x3b   : > { %v190_v1 = vsel %vm189_vm0, %v188_v0, 0.0  ;;  %s210_s6 = sld [smem:[#allocation3]]  ;;  %s187_s8 = scalar_lea.vmem [#allocation7], %s309_s30 }
  0x3c   : > { %191 = vadd.xlane.f32.xlu0 %v190_v1  ;;  %s233_s9 = sshll.u32 %s187_s8, 4  ;;  %s614_s12 = scalar_lea.hbm %s662_s3, %s312_s7  ;;  %s616_s9 = int_to_ptr.vmem [resolvable:$true] %s233_s9 }
  0x3d   : > { %s220_s13 = scalar_lea.sflag [#allocation6], %s596_s29  ;;  %s395_s14 = scalar_lea.vmem %s616_s9, 128 }
  0x3e   : > { %p396_p6 = scmp.ne.s32.totalorder %s616_s9, %s395_s14  ;;  %p671_p11 = scmp.ne.s32.totalorder %s666_s26, 0 }
  0x3f   : > { %s464_s0 = smov [#allocation7]  }
  0x40   : > { %v213_v15 = vstv %s209_s25  ;;  %p397_p12 = pnand %p396_p6, %p671_p11  ;;  %s399_s15 = sshll.u32 %s464_s0, 4  ;;  %s400_s15 = int_to_ptr.vmem [resolvable:$false] %s399_s15 }
  0x41   : > { %v216_v18 = vstv %s210_s6  ;;  %s401_s1 = scalar_lea.vmem %s400_s15, 256  ;;  %p402_p7 = scmp.lt.s32.totalorder %s616_s9, %s400_s15 }
  0x42   : > { %p398_p13 = pneg %p397_p12  ;;  %p403_p10 = scmp.lt.s32.totalorder %s401_s1, %s395_s14 }
  0x44   : > { %p404_p2 = por %p403_p10, %p402_p7 }
  0x46   : > { %p405_p4 = pnand %p404_p2, %p398_p13 }
  0xc9   : > { %v192_v2 = vpop.xlane.xlu0 %191 }
  0xca   : > { %v194_v3 = vmul.f32 0.03125, %v192_v2 }
  0xcc   : > { %v195_v4 = vsub.f32 %v188_v0, %v194_v3 }
  0xce   : > { %v196_v5 = vmul.f32 %v195_v4, %v195_v4 }
  0xd0   : > { %v197_v6 = vsel %vm189_vm0, %v196_v5, 0.0 }
  0xd1   : > { %198 = vadd.xlane.f32.xlu0 %v197_v6 }
 0x15e   : > { %v199_v7 = vpop.xlane.xlu0 %198 }
 0x15f   : > { %v201_v8 = vmul.f32 0.032258064, %v199_v7 }
 0x161   : > { %361 = vrsqrt.f32 %v201_v8  ;;  %vm204_vm1 = vcmp.eq.f32.partialorder %v201_v8, inf  ;;  %v207_v11 = vand.u32 2147483648, %v201_v8  ;;  %vm206_vm2 = vcmp.eq.f32.partialorder %v201_v8, 0.0 }
 0x16b   : > { %v362_v9 = vpop.eup %361 }
 0x16c   : > { %v203_v10 = vmul.f32 %v362_v9, %v201_v8 }
 0x16e   : > { %v205_v12 = vsel %vm204_vm1, %v201_v8, %v203_v10 }
 0x16f   : > { %v208_v13 = vsel %vm206_vm2, %v207_v11, %v205_v12 }
 0x170   : > { %v211_v14 = vadd.f32 1e-06, %v208_v13 }
 0x172   : > { %363 = vrcp.f32 %v211_v14 }
 0x17c   : > { %v364_v16 = vpop.eup %363 }
 0x17d   : > { %v214_v17 = vmul.f32 %v364_v16, %v213_v15 }
 0x17f   : > { %v215_v19 = vmul.f32 %v214_v17, %v195_v4 }
 0x181   : > { %v217_v20 = vadd.f32 %v216_v18, %v215_v19 }
 0x183   : > { %218 = vst.msk [vmem:[%s187_s8] sm:$0xff] %vm189_vm0, %v217_v20 }
 0x184   : > { %408 = shalt.err (!%p405_p4)
}
 0x185   : > { %s409_s21 = scalar_lea.hbm %s614_s12, 128  ;;  %s413_s28 = scalar_lea.hbm %s662_s3, 256 }
 0x186   : > { %p410_p5 = scmp.ne.s32.totalorder %s614_s12, %s409_s21  ;;  %p414_p0 = scmp.lt.u32.totalorder %s614_s12, %s662_s3 }
 0x187   : > { %p415_p1 = scmp.lt.u32.totalorder %s413_s28, %s409_s21  ;;  %p417_p6 = scmp.lt.u32.totalorder %s409_s21, %s614_s12 }
 0x188   : > { %p411_p8 = pnand %p410_p5, %p671_p11 }
 0x189   : > { %p416_p3 = por %p415_p1, %p414_p0 }
 0x18a   : > { %p412_p9 = pneg %p411_p8 }
 0x18b   : > { %p418_p12 = por %p417_p6, %p416_p3 }
 0x18d   : > { %p419_p13 = pnand %p418_p12, %p412_p9 }
 0x18f   : > { %422 = shalt.err (!%p419_p13)
}
 0x190   : > { %317 = dma.vmem_to_hbm [thread:$0]  (%p671_p11), %s616_s9, 128, %s614_s12, %s220_s13  }
 0x191 PF: > { %s245_s4 = sand.u32 1, %s449_s16   ;;  %p672_p7 = scmp.ne.s32.totalorder %s667_s27, 0 }
 0x192   : > { %p673_p10 = scmp.ge.s32.totalorder %s461_s19, 2  ;;  %s246_s5 = scalar_lea.sflag [#allocation6], %s245_s4 }
 0x194   : > { %p324_p2 = pnand %p673_p10, %p672_p7 }
 0x196   : > { %444 = dma.done.wait (!%p324_p2), %s246_s5, 128  }
 0x197   : > { %446 = vsyncadd (!%p324_p2), %s246_s5, 4294967168  ;;  %p18_p4 = scmp.ge.s32.totalorder %s516_s20, 4   ;;  %s674_s16 = smov %s453_s17 }
 0x198   : > { %s675_s17 = smov %s457_s18  ;;  %s676_s18 = smov %s528_s23 }
 0x199   : > { %s677_s19 = smov %s516_s20  ;;  %20 = sbr.rel (!%p18_p4) target bundleno = 8 (0x8), region = 77 }
 0x1a0   :  { %251 = vsyncpa [#allocation5], 1 }
 0x1a1   :  { %253 = vsyncpa [#allocation5 + $0x1], 1 }
 0x1a2   :  { %254 = vsyncpa [#allocation6], 1 }
 0x1a3   :  { %256 = vsyncpa [#allocation6 + $0x1], 1 }

</bundles_post_ra>
